<compile_context>
chip_gen: v7x
topology: tpu7x:2x2x1
jax: 0.10.0
libtpu: 0.0.40
codegen_flags: <defaults>
</compile_context>

<pallas_src>
import functools

import jax
import jax.numpy as jnp
from jax.experimental import pallas as pl
from jax.experimental.pallas import tpu as pltpu

BODY_INFOS_SIZE = 2
N_ACTIONS = 5
H1 = 32
H2 = 16

DEFAULT_TB = 1024  # batch tile (lanes); multiple of 128


def _round_up(x, m):
    return ((x + m - 1) // m) * m


def _mlp_kernel(body_ref, act_ref, w1a_ref, w1b_ref, b1_ref,
                w2_ref, b2_ref, w3_ref, b3_ref, o_ref):
    # Feature-major: activations are (features, TB) with TB on lanes.
    h1 = (jnp.dot(w1a_ref[...], body_ref[...], preferred_element_type=jnp.float32)
          + jnp.dot(w1b_ref[...], act_ref[...], preferred_element_type=jnp.float32)
          + b1_ref[...])                                   # (32, TB)
    h1 = jnp.maximum(h1, 0.0)
    h2 = jnp.dot(w2_ref[...], h1, preferred_element_type=jnp.float32) + b2_ref[...]
    h2 = jnp.maximum(h2, 0.0)                              # (16, TB)
    out = jnp.dot(w3_ref[...], h2, preferred_element_type=jnp.float32) + b3_ref[...]
    o_ref[...] = out.astype(o_ref.dtype)                   # (2, TB) lane-dense store


def prepare_params(params):
    """Convert PyTorch-convention (in,out) weights to the kernel's feature-major layout."""
    w1, b1, w2, b2, w3, b3 = params
    w1a = jnp.asarray(w1[:BODY_INFOS_SIZE].T, jnp.float32)   # (32, 2)
    w1b = jnp.asarray(w1[BODY_INFOS_SIZE:].T, jnp.float32)   # (32, 5)
    return (w1a, w1b,
            jnp.asarray(b1, jnp.float32).reshape(H1, 1),
            jnp.asarray(w2.T, jnp.float32),                   # (16, 32)
            jnp.asarray(b2, jnp.float32).reshape(H2, 1),
            jnp.asarray(w3.T, jnp.float32),                   # (2, 16)
            jnp.asarray(b3, jnp.float32).reshape(BODY_INFOS_SIZE, 1))


@functools.partial(jax.jit, static_argnames=("tb",))
def next_body_infos_predictor(body_infos, action, kernel_params, *, tb=DEFAULT_TB):
    """body_infos: (B, 2) f32, action: (B, 5) f32 -> (B, 2) f32."""
    w1a, w1b, b1, w2, b2, w3, b3 = kernel_params
    B = body_infos.shape[0]

    # Tile on lanes: multiple of 128, but don't over-pad tiny batches.
    tb = min(tb, _round_up(B, 128))
    Bp = _round_up(B, tb)
    grid = (Bp // tb,)

    # Layout plumbing: feature-major, batch padded to Bp on the lane axis.
    body_t = jnp.pad(body_infos.astype(jnp.float32).T, ((0, 0), (0, Bp - B)))
    act_t = jnp.pad(action.astype(jnp.float32).T, ((0, 0), (0, Bp - B)))

    batch_spec = lambda rows: pl.BlockSpec((rows, tb), lambda i: (0, i))
    const_spec = lambda arr: pl.BlockSpec(arr.shape, lambda i: (0, 0))

    out_t = pl.pallas_call(
        _mlp_kernel,
        out_shape=jax.ShapeDtypeStruct((BODY_INFOS_SIZE, Bp), jnp.float32),
        grid=grid,
        in_specs=[
            batch_spec(BODY_INFOS_SIZE),   # body_t   (2, Bp)
            batch_spec(N_ACTIONS),         # act_t    (5, Bp)
            const_spec(w1a), const_spec(w1b), const_spec(b1),
            const_spec(w2), const_spec(b2),
            const_spec(w3), const_spec(b3),
        ],
        out_specs=batch_spec(BODY_INFOS_SIZE),
        compiler_params=pltpu.CompilerParams(
            dimension_semantics=("parallel",),
            vmem_limit_bytes=32 * 1024 * 1024,
        ),
    )(body_t, act_t, w1a, w1b, b1, w2, b2, w3, b3)

    # Drop padded batch columns, back to batch-major (B, 2).
    return out_t[:, :B].T


def init_params(key):
    """Deterministic init mimicking nn.Linear default (U[-1/sqrt(fan_in), +...]).
    Weights stored as (in, out), biases as (out,)."""
    def linear(k, fan_in, fan_out):
        kw, kb = jax.random.split(k)
        bound = 1.0 / jnp.sqrt(fan_in)
        w = jax.random.uniform(kw, (fan_in, fan_out), jnp.float32, -bound, bound)
        b = jax.random.uniform(kb, (fan_out,), jnp.float32, -bound, bound)
        return w, b

    k1, k2, k3 = jax.random.split(key, 3)
    w1, b1 = linear(k1, BODY_INFOS_SIZE + N_ACTIONS, H1)
    w2, b2 = linear(k2, H1, H2)
    w3, b3 = linear(k3, H2, BODY_INFOS_SIZE)
    return (w1, b1, w2, b2, w3, b3)


if __name__ == "__main__":
    key = jax.random.PRNGKey(0)
    k_params, k_body, k_act = jax.random.split(key, 3)

    B = 8
    params = init_params(k_params)
    kernel_params = prepare_params(params)
    body_infos = jax.random.normal(k_body, (B, BODY_INFOS_SIZE), jnp.float32)
    action = jax.random.normal(k_act, (B, N_ACTIONS), jnp.float32)

    out = next_body_infos_predictor(body_infos, action, kernel_params)
    jax.block_until_ready(out)

    # Pure-JAX reference of the same math (batch-major, PyTorch-equivalent).
    x = jnp.concatenate([body_infos, action], axis=-1)
    w1, b1, w2, b2, w3, b3 = params
    ref = jnp.maximum(x @ w1 + b1, 0.0)
    ref = jnp.maximum(ref @ w2 + b2, 0.0)
    ref = ref @ w3 + b3
    assert out.shape == (B, BODY_INFOS_SIZE)
    assert jnp.allclose(out, ref, atol=1e-5, rtol=1e-5)

    print("KERNEL_OK")
</pallas_src>

<mosaic_0001>
module attributes {stable_mosaic.version = 11 : i64} {
  func.func @_mlp_kernel(%arg0: i32, %arg1: memref<2x128xf32, #tpu.memory_space<vmem>>, %arg2: memref<5x128xf32, #tpu.memory_space<vmem>>, %arg3: memref<32x2xf32, #tpu.memory_space<vmem>>, %arg4: memref<32x5xf32, #tpu.memory_space<vmem>>, %arg5: memref<32x1xf32, #tpu.memory_space<vmem>>, %arg6: memref<16x32xf32, #tpu.memory_space<vmem>>, %arg7: memref<16x1xf32, #tpu.memory_space<vmem>>, %arg8: memref<2x16xf32, #tpu.memory_space<vmem>>, %arg9: memref<2x1xf32, #tpu.memory_space<vmem>>, %arg10: memref<2x128xf32, #tpu.memory_space<vmem>>) attributes {dimension_semantics = [#tpu.dimension_semantics<parallel>], iteration_bounds = array<i64: 1>, scalar_prefetch = 0 : i64, scratch_operands = 0 : i64, tpu.core_type = #tpu.core_type<tc>, window_params = [{transform_indices = @transform_0, window_bounds = array<i64: 2, 128>}, {transform_indices = @transform_1, window_bounds = array<i64: 5, 128>}, {pipeline_mode = #tpu.pipeline_mode<synchronous>, transform_indices = @transform_2, window_bounds = array<i64: 32, 2>}, {pipeline_mode = #tpu.pipeline_mode<synchronous>, transform_indices = @transform_3, window_bounds = array<i64: 32, 5>}, {pipeline_mode = #tpu.pipeline_mode<synchronous>, transform_indices = @transform_4, window_bounds = array<i64: 32, 1>}, {pipeline_mode = #tpu.pipeline_mode<synchronous>, transform_indices = @transform_5, window_bounds = array<i64: 16, 32>}, {pipeline_mode = #tpu.pipeline_mode<synchronous>, transform_indices = @transform_6, window_bounds = array<i64: 16, 1>}, {pipeline_mode = #tpu.pipeline_mode<synchronous>, transform_indices = @transform_7, window_bounds = array<i64: 2, 16>}, {pipeline_mode = #tpu.pipeline_mode<synchronous>, transform_indices = @transform_8, window_bounds = array<i64: 2, 1>}, {transform_indices = @transform_9, window_bounds = array<i64: 2, 128>}]} {
    %c0 = arith.constant 0 : index
    %c0_0 = arith.constant 0 : index
    %0 = vector.load %arg3[%c0, %c0_0] : memref<32x2xf32, #tpu.memory_space<vmem>>, vector<32x2xf32>
    %c0_1 = arith.constant 0 : index
    %c0_2 = arith.constant 0 : index
    %1 = vector.load %arg1[%c0_1, %c0_2] : memref<2x128xf32, #tpu.memory_space<vmem>>, vector<2x128xf32>
    %cst = arith.constant dense<0.000000e+00> : vector<32x128xf32>
    %2 = tpu.matmul %0, %1, %cst {dimension_numbers = #tpu.dot_dimension_numbers<[1], [0], [0], [1], [0, 0, 1, 1], [], []>} : vector<32x2xf32>, vector<2x128xf32>, vector<32x128xf32> -> vector<32x128xf32>
    %c0_3 = arith.constant 0 : index
    %c0_4 = arith.constant 0 : index
    %3 = vector.load %arg4[%c0_3, %c0_4] : memref<32x5xf32, #tpu.memory_space<vmem>>, vector<32x5xf32>
    %c0_5 = arith.constant 0 : index
    %c0_6 = arith.constant 0 : index
    %4 = vector.load %arg2[%c0_5, %c0_6] : memref<5x128xf32, #tpu.memory_space<vmem>>, vector<5x128xf32>
    %cst_7 = arith.constant dense<0.000000e+00> : vector<32x128xf32>
    %5 = tpu.matmul %3, %4, %cst_7 {dimension_numbers = #tpu.dot_dimension_numbers<[1], [0], [0], [1], [0, 0, 1, 1], [], []>} : vector<32x5xf32>, vector<5x128xf32>, vector<32x128xf32> -> vector<32x128xf32>
    %6 = arith.addf %2, %5 : vector<32x128xf32>
    %c0_8 = arith.constant 0 : index
    %c0_9 = arith.constant 0 : index
    %7 = vector.load %arg5[%c0_8, %c0_9] : memref<32x1xf32, #tpu.memory_space<vmem>>, vector<32x1xf32>
    %8 = vector.broadcast %7 : vector<32x1xf32> to vector<32x128xf32>
    %9 = arith.addf %6, %8 : vector<32x128xf32>
    %cst_10 = arith.constant 0.000000e+00 : f32
    %10 = vector.broadcast %cst_10 : f32 to vector<32x128xf32>
    %11 = arith.maximumf %9, %10 : vector<32x128xf32>
    %c0_11 = arith.constant 0 : index
    %c0_12 = arith.constant 0 : index
    %12 = vector.load %arg6[%c0_11, %c0_12] : memref<16x32xf32, #tpu.memory_space<vmem>>, vector<16x32xf32>
    %cst_13 = arith.constant dense<0.000000e+00> : vector<16x128xf32>
    %13 = tpu.matmul %12, %11, %cst_13 {dimension_numbers = #tpu.dot_dimension_numbers<[1], [0], [0], [1], [0, 0, 1, 1], [], []>} : vector<16x32xf32>, vector<32x128xf32>, vector<16x128xf32> -> vector<16x128xf32>
    %c0_14 = arith.constant 0 : index
    %c0_15 = arith.constant 0 : index
    %14 = vector.load %arg7[%c0_14, %c0_15] : memref<16x1xf32, #tpu.memory_space<vmem>>, vector<16x1xf32>
    %15 = vector.broadcast %14 : vector<16x1xf32> to vector<16x128xf32>
    %16 = arith.addf %13, %15 : vector<16x128xf32>
    %cst_16 = arith.constant 0.000000e+00 : f32
    %17 = vector.broadcast %cst_16 : f32 to vector<16x128xf32>
    %18 = arith.maximumf %16, %17 : vector<16x128xf32>
    %c0_17 = arith.constant 0 : index
    %c0_18 = arith.constant 0 : index
    %19 = vector.load %arg8[%c0_17, %c0_18] : memref<2x16xf32, #tpu.memory_space<vmem>>, vector<2x16xf32>
    %cst_19 = arith.constant dense<0.000000e+00> : vector<2x128xf32>
    %20 = tpu.matmul %19, %18, %cst_19 {dimension_numbers = #tpu.dot_dimension_numbers<[1], [0], [0], [1], [0, 0, 1, 1], [], []>} : vector<2x16xf32>, vector<16x128xf32>, vector<2x128xf32> -> vector<2x128xf32>
    %c0_20 = arith.constant 0 : index
    %c0_21 = arith.constant 0 : index
    %21 = vector.load %arg9[%c0_20, %c0_21] : memref<2x1xf32, #tpu.memory_space<vmem>>, vector<2x1xf32>
    %22 = vector.broadcast %21 : vector<2x1xf32> to vector<2x128xf32>
    %23 = arith.addf %20, %22 : vector<2x128xf32>
    %c0_22 = arith.constant 0 : index
    %c0_23 = arith.constant 0 : index
    %24 = vector.load %arg10[%c0_22, %c0_23] : memref<2x128xf32, #tpu.memory_space<vmem>>, vector<2x128xf32>
    tpu.vector_store %arg10[%c0_22, %c0_23], %23 {strides = array<i32>} : memref<2x128xf32, #tpu.memory_space<vmem>>, vector<2x128xf32>,
    return
  }
  func.func @transform_0(%arg0: i32) -> (i32, i32) {
    %c0_i32 = arith.constant 0 : i32
    %c0_i32_0 = arith.constant 0 : i32
    return %c0_i32, %arg0 : i32, i32
  }
  func.func @transform_1(%arg0: i32) -> (i32, i32) {
    %c0_i32 = arith.constant 0 : i32
    %c0_i32_0 = arith.constant 0 : i32
    return %c0_i32, %arg0 : i32, i32
  }
  func.func @transform_2(%arg0: i32) -> (i32, i32) {
    %c0_i32 = arith.constant 0 : i32
    %c0_i32_0 = arith.constant 0 : i32
    %c0_i32_1 = arith.constant 0 : i32
    return %c0_i32, %c0_i32_0 : i32, i32
  }
  func.func @transform_3(%arg0: i32) -> (i32, i32) {
    %c0_i32 = arith.constant 0 : i32
    %c0_i32_0 = arith.constant 0 : i32
    %c0_i32_1 = arith.constant 0 : i32
    return %c0_i32, %c0_i32_0 : i32, i32
  }
  func.func @transform_4(%arg0: i32) -> (i32, i32) {
    %c0_i32 = arith.constant 0 : i32
    %c0_i32_0 = arith.constant 0 : i32
    %c0_i32_1 = arith.constant 0 : i32
    return %c0_i32, %c0_i32_0 : i32, i32
  }
  func.func @transform_5(%arg0: i32) -> (i32, i32) {
    %c0_i32 = arith.constant 0 : i32
    %c0_i32_0 = arith.constant 0 : i32
    %c0_i32_1 = arith.constant 0 : i32
    return %c0_i32, %c0_i32_0 : i32, i32
  }
  func.func @transform_6(%arg0: i32) -> (i32, i32) {
    %c0_i32 = arith.constant 0 : i32
    %c0_i32_0 = arith.constant 0 : i32
    %c0_i32_1 = arith.constant 0 : i32
    return %c0_i32, %c0_i32_0 : i32, i32
  }
  func.func @transform_7(%arg0: i32) -> (i32, i32) {
    %c0_i32 = arith.constant 0 : i32
    %c0_i32_0 = arith.constant 0 : i32
    %c0_i32_1 = arith.constant 0 : i32
    return %c0_i32, %c0_i32_0 : i32, i32
  }
  func.func @transform_8(%arg0: i32) -> (i32, i32) {
    %c0_i32 = arith.constant 0 : i32
    %c0_i32_0 = arith.constant 0 : i32
    %c0_i32_1 = arith.constant 0 : i32
    return %c0_i32, %c0_i32_0 : i32, i32
  }
  func.func @transform_9(%arg0: i32) -> (i32, i32) {
    %c0_i32 = arith.constant 0 : i32
    %c0_i32_0 = arith.constant 0 : i32
    return %c0_i32, %arg0 : i32, i32
  }
}

</mosaic_0001>

<bundles_post_ra>
// kernel: next_body_infos_predictor.1
= control target key start
LH: loop header
LB: loop body
LE: loop exit
PB: predicated region body
PF: predicated region fallthrough
CT: control target
= control target key end

     0   :  { %vm55_vm0 = vcmask 1044480   ;;  %vm42_vm1 = vcmask 39936   ;;  %vm157_vm2 = vcmask 1041408   ;;  %v549_v5 = vmov 0   ;;  %s676_s1 = inlined_call_operand.vmem [shape: f32[5,128], index: 1, kind: input, shape index: {}]   ;;  %s677_s3 = inlined_call_operand.vmem [shape: f32[32,5], index: 3, kind: input, shape index: {}]   ;;  %s678_s0 = inlined_call_operand.vmem [shape: f32[2,128], index: 0, kind: input, shape index: {}]   ;;  %s679_s4 = inlined_call_operand.vmem [shape: f32[32,1], index: 4, kind: input, shape index: {}]   ;;  %s680_s2 = inlined_call_operand.vmem [shape: f32[32,2], index: 2, kind: input, shape index: {}]   ;;  %s681_s6 = inlined_call_operand.vmem [shape: f32[16,1], index: 6, kind: input, shape index: {}]   ;;  %s682_s8 = inlined_call_operand.vmem [shape: f32[2,1], index: 8, kind: input, shape index: {}]   ;;  %s683_s5 = inlined_call_operand.vmem [shape: f32[16,32], index: 5, kind: input, shape index: {}]   ;;  %s684_s7 = inlined_call_operand.vmem [shape: f32[2,16], index: 7, kind: input, shape index: {}]   ;;  %s685_s9 = inlined_call_operand.vmem [shape: f32[2,128], index: 9, kind: output, shape index: {}]  }
   0x1   :  { %v41_v0 = vld [vmem:[%s676_s1] sm:$0x1f]  ;;  %v38_v2 = vld [vmem:[%s677_s3 + $0x8] sm:$0xff]  ;;  %v39_v4 = vld [vmem:[%s677_s3 + $0x10] sm:$0xff]  ;;  %547 = vset.pattern.permute.xlu0 %v549_v5  ;;  %vm144_vm3 = vcmask 15360   ;;  %548 = vset.pattern.permute.xlu1 %v549_v5  ;;  %vm292_vm4 = vcmask 261120  }
   0x2   :  { %v37_v1 = vld [vmem:[%s677_s3] sm:$0xff]  ;;  %494 = vmatprep.subr.msk.mxu0 %vm55_vm0, %v41_v0  ;;  %v40_v7 = vld [vmem:[%s677_s3 + $0x18] sm:$0xff]  ;;  %v248_v8 = vld [vmem:[%s679_s4 + $0x10] sm:$0xff]  ;;  %v550_v38 = vmov 0.0|0.0   ;;  %vm551_vm5 = vmmov 0   ;;  %v552_v39 = vmov 0.0  }
   0x3   :  { %496 = vmatprep.mubr.msk.f32.mxu0 %vm42_vm1, %v37_v1  ;;  %v36_v3 = vld [vmem:[%s678_s0] sm:$0x3]  ;;  %495 = vmatpush3.msk.msra.mxu0 %vm55_vm0, %v41_v0  ;;  %v247_v10 = vld [vmem:[%s679_s4 + $0x8] sm:$0xff]  ;;  %v249_v11 = vld [vmem:[%s679_s4 + $0x18] sm:$0xff]  ;;  %vm383_vm6 = vcmask 130048  }
   0x4   :  { %497 = vmatmul.mubr.msk.f32.vlgmr.msra.gmra.mrb[0].mxu0 %vm42_vm1, %v38_v2  ;;  %502 = vmatprep.subr.msk.mxu0 %vm157_vm2, %v36_v3  ;;  %v246_v6 = vld [vmem:[%s679_s4] sm:$0xff]  ;;  %v33_v12 = vld [vmem:[%s680_s2 + $0x8] sm:$0xff]  ;;  %v34_v13 = vld [vmem:[%s680_s2 + $0x10] sm:$0xff] }
   0x5   :  { %503 = vmatpush3.msk.msra.mxu0 %vm157_vm2, %v36_v3  ;;  %499 = vmatprep.mubr.msk.f32.mxu0 %vm42_vm1, %v39_v4  ;;  %v32_v9 = vld [vmem:[%s680_s2] sm:$0xff]  ;;  %v281_v15 = vld [vmem:[%s681_s6 + $0x8] sm:$0xff]  ;;  %v35_v16 = vld [vmem:[%s680_s2 + $0x18] sm:$0xff] }
   0x6   :  { %252 = vperm.xlu0 %547, %v246_v6   ;;  %262 = vperm.xlu1 %548, %v248_v8   ;;  %v280_v14 = vld [vmem:[%s681_s6] sm:$0xff]  ;;  %v279_v37 = vld [vmem:[%s683_s5 + $0x8] sm:$0xff] }
   0x7   :  { %v377_v17 = vld [vmem:[%s682_s8] sm:$0x3] }
   0x8   :  { %500 = vmatmul.mubr.msk.f32.gmra.mrb[2].mxu0 %vm42_vm1, %v40_v7  ;;  %v278_v18 = vld [vmem:[%s683_s5] sm:$0xff] }
   0x9   :  { %504 = vmatprep.mubr.msk.f32.mxu0 %vm144_vm3, %v32_v9  ;;  %518 = vmatprep.mubr.msk.f32.mxu1 %vm292_vm4, %v278_v18  ;;  %v376_v49 = vld [vmem:[%s684_s7] sm:$0x3] }
   0xa   :  { %257 = vperm.xlu0 %547, %v247_v10   ;;  %267 = vperm.xlu1 %548, %v249_v11  }
   0xc   :  { %505 = vmatmul.mubr.msk.f32.vlgmr.msra.gmra.mrb[0].mxu0 %vm144_vm3, %v33_v12 }
   0xd   :  { %507 = vmatprep.mubr.msk.f32.mxu0 %vm144_vm3, %v34_v13 }
   0xe   :  { %284 = vperm.xlu0 %547, %v280_v14   ;;  %289 = vperm.xlu1 %548, %v281_v15  }
  0x10   :  { %508 = vmatmul.mubr.msk.f32.gmra.mrb[2].mxu0 %vm144_vm3, %v35_v16 }
  0x12   :  { %380 = vperm.xlu0 %547, %v377_v17  }
  0x85   :  { %v253_v19 = vpop.permute.xlu0 %252  ;;  %v263_v20 = vpop.permute.xlu1 %262 }
  0x89   :  { %v258_v21 = vpop.permute.xlu0 %257  ;;  %v268_v27 = vpop.permute.xlu1 %267 }
  0x8d   :  { %v290_v40 = vpop.permute.xlu1 %289  ;;  %v285_v42 = vpop.permute.xlu0 %284 }
  0x91   :  { %v381_v50 = vpop.permute.xlu0 %380 }
  0xdf   :  { %v506_v22 = vpop.f32.mrb[0].mxu0 }
  0xe0   :  { %v271_v23 = vadd.f32 %v506_v22, %v258_v21  ;;  %v227_v24 = vpop.f32.mrb[1].mxu0 }
  0xe1   :  { %v270_v25 = vadd.f32 %v253_v19, %v227_v24 }
  0xe2   :  { %v275_v26 = vmax.f32 %v271_v23, 0.0 }
  0xe3   :  { %v274_v28 = vmax.f32 %v270_v25, 0.0  ;;  %v509_v29 = vpop.f32.mrb[2].mxu0 }
  0xe4   :  { %v273_v30 = vadd.f32 %v509_v29, %v268_v27  ;;  %v237_v31 = vpop.f32.mrb[3].mxu0 }
  0xe5   :  { %v272_v32 = vadd.f32 %v263_v20, %v237_v31  ;;  %v528_v33 = vpack.c.bf16 %v275_v26, %v274_v28 }
  0xe6   :  { %v277_v34 = vmax.f32 %v273_v30, 0.0 }
  0xe7   :  { %v276_v35 = vmax.f32 %v272_v32, 0.0  ;;  %529 = vmatprep.subr.bf16.mxu1 %v528_v33 }
  0xe8   :  { %531 = vmatpush3.bf16.msra.mxu1 %v528_v33 }
  0xe9   :  { %v532_v36 = vpack.c.bf16 %v277_v34, %v276_v35 }
  0xeb   :  { %533 = vmatprep.subr.bf16.mxu1 %v532_v36 }
  0xec   :  { %535 = vmatpush3.bf16.msra.mxu1 %v532_v36 }
  0xed   :  { %536 = vmatprep.subr.bf16.mxu1 %v550_v38 }
  0xef   :  { %519 = vmatmul.mubr.msk.f32.vlgmr.msra.gmra.mrb[0].mxu1 %vm292_vm4, %v279_v37 }
  0xf0   :  { %525 = vmatprep.mubr.msk.f32.mxu1 %vm551_vm5, %v552_v39 }
 0x1c2   :  { %v520_v41 = vpop.f32.mrb[0].mxu1 }
 0x1c3   :  { %v371_v43 = vadd.f32 %v520_v41, %v290_v40  ;;  %v365_v44 = vpop.f32.mrb[1].mxu1 }
 0x1c4   :  { %v366_v45 = vadd.f32 %v365_v44, %v285_v42 }
 0x1c5   :  { %v375_v46 = vmax.f32 %v371_v43, 0.0 }
 0x1c6   :  { %v374_v47 = vmax.f32 %v366_v45, 0.0 }
 0x1c8   :  { %v537_v48 = vpack.c.bf16 %v375_v46, %v374_v47 }
 0x1ca   :  { %538 = vmatpush3.bf16.msra.mxu1 %v537_v48 }
 0x1cd   :  { %526 = vmatmul.mubr.msk.f32.vlgmr.msra.gmra.mrb[2].mxu1 %vm383_vm6, %v376_v49 }
 0x2a0   :  { %v453_v51 = vpop.f32.mrb[2].mxu1 }
 0x2a1   :  { %v454_v52 = vadd.f32 %v453_v51, %v381_v50  ;;  %v527_v53 = vpop.f32.mrb[3].mxu1 }
 0x2a3   :  { %457 = vst [vmem:[%s685_s9] sm:$0x3] %v454_v52 }

</bundles_post_ra>
